<compile_context>
chip_gen: v7x
topology: tpu7x:2x2x1
jax: 0.10.0
libtpu: 0.0.40
codegen_flags: <defaults>
</compile_context>

<pallas_src>
import functools

import jax
import jax.numpy as jnp
from jax.experimental import pallas as pl
from jax.experimental.pallas import tpu as pltpu

_TARGET_BLOCK_BYTES = 2 * 1024 * 1024  # ~2 MiB per input block


def _largest_divisor_at_most(n, cap):
    cap = max(1, min(n, cap))
    for t in range(cap, 0, -1):
        if n % t == 0:
            return t
    return 1


# ---------------------------------------------------------------------------
# Small-S path: lane-dense blocks + MXU segmented reduce.
# ---------------------------------------------------------------------------
def _pool_small_s_kernel(x_ref, m_ref, o_ref, *, inv_s):
    # x_ref: (TB*C//g, 128)   m_ref: (128, g)   o_ref: (TB*C//g, g)
    # Segmented per-channel sum on the MXU.  HIGHEST precision keeps float32
    # inputs accurate to ~1 ulp (bf16 x {0,1} products are exact regardless);
    # the matmul cost is negligible next to the HBM stream.
    acc = jnp.dot(
        x_ref[...],
        m_ref[...],
        preferred_element_type=jnp.float32,
        precision=jax.lax.Precision.HIGHEST,
    )
    o_ref[...] = (acc * inv_s).astype(o_ref.dtype)


def _pool_small_s(x3, n, c, s):
    g = 128 // s
    cg = c // g
    lanes = g * s  # == 128
    itemsize = x3.dtype.itemsize

    # Pure contiguous reshape: no data movement, lane-dense rows of 128.
    x_flat = x3.reshape(n * cg, lanes)

    # Block-diagonal ones matrix: m[l, j] = 1  iff  l // s == j.
    m = (jnp.arange(lanes)[:, None] // s == jnp.arange(g)[None, :]).astype(x3.dtype)

    per_sample = cg * lanes * itemsize
    tb_cap = max(1, _TARGET_BLOCK_BYTES // per_sample)
    if n >= 2:
        tb_cap = min(tb_cap, n // 2)  # >= 2 parallel grid steps for v7x megacore
    tb = _largest_divisor_at_most(n, tb_cap)
    nb = n // tb

    cost = pl.CostEstimate(
        flops=2 * n * cg * lanes * g,
        transcendentals=0,
        bytes_accessed=n * c * s * itemsize + n * c * itemsize,
    )

    out = pl.pallas_call(
        functools.partial(_pool_small_s_kernel, inv_s=1.0 / s),
        out_shape=jax.ShapeDtypeStruct((n * cg, g), x3.dtype),
        grid_spec=pltpu.PrefetchScalarGridSpec(
            num_scalar_prefetch=0,
            grid=(nb,),
            in_specs=[
                pl.BlockSpec((tb * cg, lanes), lambda i: (i, 0)),
                # Constant block index -> the tiny ones matrix stays resident.
                pl.BlockSpec((lanes, g), lambda i: (0, 0)),
            ],
            out_specs=pl.BlockSpec((tb * cg, g), lambda i: (i, 0)),
        ),
        compiler_params=pltpu.CompilerParams(
            dimension_semantics=("parallel",),
        ),
        cost_estimate=cost,
    )(x_flat, m)

    # (N*C//g, g) row-major is exactly channel order -> free reshape to (N, C).
    return out.reshape(n, c)


# ---------------------------------------------------------------------------
# General path: S-tiled reduction with a float32 VMEM accumulator.
# ---------------------------------------------------------------------------
def _pool_general_kernel(x_ref, o_ref, acc_ref, *, inv_s):
    # x_ref: (TB, C, TS)   o_ref: (TB, 1, C)   acc_ref: (TB, C) float32
    k = pl.program_id(1)

    @pl.when(k == 0)
    def _():
        acc_ref[...] = jnp.zeros_like(acc_ref)

    # f32 accumulation without materializing an f32 copy of the whole block.
    acc_ref[...] += jnp.sum(x_ref[...], axis=-1, dtype=jnp.float32)

    @pl.when(k == pl.num_programs(1) - 1)
    def _():
        # Divide by the FULL reduction length, not the per-block tile.
        o_ref[...] = ((acc_ref[...] * inv_s)[:, None, :]).astype(o_ref.dtype)


def _pool_general(x3, n, c, s):
    itemsize = x3.dtype.itemsize

    # Tile S in multiples of 128 when possible (a block's last dim must be a
    # multiple of 128 or the full extent); otherwise use the full S.
    if s % 128 == 0:
        max_units = max(1, _TARGET_BLOCK_BYTES // (c * 128 * itemsize))
        ts = _largest_divisor_at_most(s // 128, max_units) * 128
    else:
        ts = s
    nk = s // ts

    # Estimate VMEM footprint with (8, 128) padding so tiny / odd S never
    # oversizes the batch tile.
    ts_vmem = ((ts + 127) // 128) * 128
    c_vmem = ((c + 7) // 8) * 8
    per_sample = c_vmem * ts_vmem * itemsize
    tb_cap = max(1, _TARGET_BLOCK_BYTES // per_sample)
    if n >= 2:
        tb_cap = min(tb_cap, n // 2)  # >= 2 parallel grid steps for v7x megacore
    tb = _largest_divisor_at_most(n, tb_cap)
    nb = n // tb

    cost = pl.CostEstimate(
        flops=n * c * s,
        transcendentals=0,
        bytes_accessed=n * c * s * itemsize + n * c * itemsize,
    )

    out = pl.pallas_call(
        functools.partial(_pool_general_kernel, inv_s=1.0 / s),
        out_shape=jax.ShapeDtypeStruct((n, 1, c), x3.dtype),
        grid_spec=pltpu.PrefetchScalarGridSpec(
            num_scalar_prefetch=0,
            grid=(nb, nk),
            in_specs=[pl.BlockSpec((tb, c, ts), lambda i, k: (i, 0, k))],
            out_specs=pl.BlockSpec((tb, 1, c), lambda i, k: (i, 0, 0)),
            scratch_shapes=[pltpu.VMEM((tb, c), jnp.float32)],
        ),
        compiler_params=pltpu.CompilerParams(
            dimension_semantics=("parallel", "arbitrary"),
        ),
        cost_estimate=cost,
    )(x3)

    return out.reshape(n, c)


def adaptive_pool(x):
    """x: (N, C, D, H, W) -> AdaptiveAvgPool3d((1,1,1)) followed by .view(-1, 512)."""
    n, c, d, h, w = x.shape
    s = d * h * w
    x3 = x.reshape(n, c, s)  # contiguous view, no data movement

    g = 128 // s if (s < 128 and 128 % s == 0) else 0
    if g > 0 and c % g == 0 and (c // g) % 8 == 0:
        pooled = _pool_small_s(x3, n, c, s)
    else:
        pooled = _pool_general(x3, n, c, s)

    return pooled.reshape(-1, 512)  # matches .view(-1, 512)


if __name__ == "__main__":
    key = jax.random.PRNGKey(0)
    k1, k2 = jax.random.split(key)

    # Shape implied by the module: C == 512 (view(-1, 512)), small spatial extent.
    N, C, D, H, W = 2, 512, 2, 4, 4
    x_small = jax.random.normal(k1, (N, C, D, H, W), dtype=jnp.float32)
    y_small = jax.block_until_ready(adaptive_pool(x_small))
    ref_small = jnp.mean(x_small, axis=(2, 3, 4)).reshape(-1, 512)
    assert y_small.shape == (N, 512), y_small.shape
    # Lane-dense path reduces on the MXU; with HIGHEST precision the true error
    # is ~1e-6 — the margin only guards against f32-matmul pass configuration.
    err_small = float(jnp.max(jnp.abs(y_small - ref_small)))
    assert jnp.allclose(y_small, ref_small, atol=1e-3, rtol=1e-3), err_small

    # Larger spatial extent: exercises the S-tiled accumulator (general) path.
    N2, D2, H2, W2 = 2, 8, 16, 16
    x_big = jax.random.normal(k2, (N2, C, D2, H2, W2), dtype=jnp.float32)
    y_big = jax.block_until_ready(adaptive_pool(x_big))
    ref_big = jnp.mean(x_big, axis=(2, 3, 4)).reshape(-1, 512)
    assert y_big.shape == (N2, 512), y_big.shape
    err_big = float(jnp.max(jnp.abs(y_big - ref_big)))
    assert jnp.allclose(y_big, ref_big, atol=1e-5, rtol=1e-5), err_big

    print("KERNEL_OK")
</pallas_src>

<mosaic_0001>
module attributes {stable_mosaic.version = 11 : i64} {
  func.func @_pool_small_s_kernel(%arg0: i32, %arg1: memref<128x128xf32, #tpu.memory_space<vmem>>, %arg2: memref<128x4xf32, #tpu.memory_space<vmem>>, %arg3: memref<128x4xf32, #tpu.memory_space<vmem>>) attributes {dimension_semantics = [#tpu.dimension_semantics<parallel>], iteration_bounds = array<i64: 2>, scalar_prefetch = 0 : i64, scratch_operands = 0 : i64, tpu.core_type = #tpu.core_type<tc>, window_params = [{transform_indices = @transform_0, window_bounds = array<i64: 128, 128>}, {pipeline_mode = #tpu.pipeline_mode<synchronous>, transform_indices = @transform_1, window_bounds = array<i64: 128, 4>}, {transform_indices = @transform_2, window_bounds = array<i64: 128, 4>}]} {
    %c0 = arith.constant 0 : index
    %c0_0 = arith.constant 0 : index
    %0 = vector.load %arg1[%c0, %c0_0] : memref<128x128xf32, #tpu.memory_space<vmem>>, vector<128x128xf32>
    %c0_1 = arith.constant 0 : index
    %c0_2 = arith.constant 0 : index
    %1 = vector.load %arg2[%c0_1, %c0_2] : memref<128x4xf32, #tpu.memory_space<vmem>>, vector<128x4xf32>
    %cst = arith.constant dense<0.000000e+00> : vector<128x4xf32>
    %2 = tpu.matmul %0, %1, %cst {dimension_numbers = #tpu.dot_dimension_numbers<[1], [0], [0], [1], [0, 0, 1, 1], [], []>, precision = #tpu.contract_precision<fp32>} : vector<128x128xf32>, vector<128x4xf32>, vector<128x4xf32> -> vector<128x4xf32>
    %cst_3 = arith.constant 3.125000e-02 : f32
    %3 = vector.broadcast %cst_3 : f32 to vector<128x4xf32>
    %4 = arith.mulf %2, %3 : vector<128x4xf32>
    %c0_4 = arith.constant 0 : index
    %c0_5 = arith.constant 0 : index
    %5 = vector.load %arg3[%c0_4, %c0_5] : memref<128x4xf32, #tpu.memory_space<vmem>>, vector<128x4xf32>
    tpu.vector_store %arg3[%c0_4, %c0_5], %4 {strides = array<i32>} : memref<128x4xf32, #tpu.memory_space<vmem>>, vector<128x4xf32>,
    return
  }
  func.func @transform_0(%arg0: i32) -> (i32, i32) {
    %c0_i32 = arith.constant 0 : i32
    %c0_i32_0 = arith.constant 0 : i32
    return %arg0, %c0_i32 : i32, i32
  }
  func.func @transform_1(%arg0: i32) -> (i32, i32) {
    %c0_i32 = arith.constant 0 : i32
    %c0_i32_0 = arith.constant 0 : i32
    %c0_i32_1 = arith.constant 0 : i32
    return %c0_i32, %c0_i32_0 : i32, i32
  }
  func.func @transform_2(%arg0: i32) -> (i32, i32) {
    %c0_i32 = arith.constant 0 : i32
    %c0_i32_0 = arith.constant 0 : i32
    return %arg0, %c0_i32 : i32, i32
  }
}

</mosaic_0001>

<bundles_post_ra>
// kernel: tpu_custom_call.1
= control target key start
LH: loop header
LB: loop body
LE: loop exit
PB: predicated region body
PF: predicated region fallthrough
CT: control target
= control target key end

     0   :  { %7 = vsyncpa [#allocation3], 0  ;;  %s3239_s0 = inlined_call_operand.hbm [shape: f32[256,128], index: 0, kind: input, shape index: {}]   ;;  %s3240_s1 = inlined_call_operand.vmem [shape: f32[128,4], index: 1, kind: input, shape index: {}]   ;;  %s3241_s2 = inlined_call_operand.vmem [shape: f32[256,4], index: 2, kind: output, shape index: {}]  }
   0x1   :  { %9 = vsyncpa [#allocation3 + $0x1], 0  ;;  %s2523_s9 = smov 0   ;;  %s2525_s10 = smov 0  }
   0x2   :  { %s2527_s11 = smov 0   ;;  %s2529_s12 = smov 0  }
   0x3 LB: > { %s1584_s13 = sadd.s32 4294967295, %s2503_s12   ;;  %s2543_s14 = sadd.s32 1, %s2503_s12   ;;  %s2503_s12 = sphi %s2529_s12, %s3367_s12   ;;  %s2499_s11 = sphi %s2527_s11, %s3366_s11   ;;  %s2495_s10 = sphi %s2525_s10, %s3365_s10   ;;  %s2491_s9 = sphi %s2523_s9, %s3364_s9  }
   0x4   : > { %s19_s15 = ssub.s32 %s2503_s12, %s2543_s14  ;;  %s22_s16 = sadd.s32 1, %s2499_s11 }
   0x5   : > { %p20_p0 = scmp.eq.s32.totalorder %s19_s15, 0  ;;  %p29_p1 = scmp.ne.s32.totalorder %s2499_s11, %s2495_s10 }
   0x6   : > { %p30_p2 = scmp.eq.s32.totalorder %s2503_s12, 0  ;;  %p35_p3 = scmp.ne.s32.totalorder %s2495_s10, %s2491_s9 }
   0x7   : > { %s2553_s17 = scalar_select %p20_p0, %s2499_s11, %s22_s16  }
   0x8   : > { %p31_p4 = por %p30_p2, %p29_p1  ;;  %p36_p5 = scmp.eq.s32.totalorder %s1584_s13, 0 }
   0x9   : > { %p2404_p6 = scmp.lt.s32.totalorder %s2503_s12, 2  ;;  %s109_s19 = sand.u32 1, %s2499_s11  }
   0xa   : > { %p2558_p7 = por %p36_p5, %p35_p3  ;;  %s1588_s20 = sshll.u32 %s109_s19, 7 }
   0xb   : > { %s1597_s21 = sshll.u32 %s2503_s12, 11  ;;  %s113_s25 = scalar_lea.vmem [#allocation2], %s1588_s20 }
   0xc   : > { %s2567_s24 = scalar_lea.hbm %s3239_s0, %s1597_s21  ;;  %s120_s26 = sshll.u32 %s113_s25, 4  ;;  %s2569_s26 = int_to_ptr.vmem [resolvable:$true] %s120_s26 }
   0xd   : > { %p2571_p8 = pnand %p2404_p6, %p31_p4  ;;  %s2576_s28 = scalar_lea.sflag [#allocation3], %s109_s19 }
   0xe   : > { %s2439_s29 = scalar_lea.hbm %s2567_s24, 2048  ;;  %s2444_s4 = scalar_lea.hbm %s3239_s0, 4096 }
   0xf   : > { %p2440_p10 = scmp.ne.s32.totalorder %s2567_s24, %s2439_s29  ;;  %p2441_p11 = pneg %p2571_p8 }
  0x10   : > { %p2445_p0 = scmp.lt.u32.totalorder %s2567_s24, %s3239_s0  ;;  %p2446_p1 = scmp.lt.u32.totalorder %s2444_s4, %s2439_s29 }
  0x11   : > { %p2442_p12 = pnand %p2441_p11, %p2440_p10  ;;  %p2448_p3 = scmp.lt.u32.totalorder %s2439_s29, %s2567_s24 }
  0x12   : > { %p2447_p2 = por %p2446_p1, %p2445_p0 }
  0x13   : > { %p2443_p13 = pneg %p2442_p12 }
  0x14   : > { %p2449_p4 = por %p2448_p3, %p2447_p2 }
  0x16   : > { %p2450_p5 = pnand %p2449_p4, %p2443_p13 }
  0x18   : > { %2453 = shalt.err (!%p2450_p5)
}
  0x19   : > { %s2454_s7 = scalar_lea.vmem %s2569_s26, 2048  ;;  %s2505_s8 = smov [#allocation2]  }
  0x1a   : > { %p2455_p6 = scmp.ne.s32.totalorder %s2569_s26, %s2454_s7  ;;  %s2459_s9 = sshll.u32 %s2505_s8, 4  ;;  %s2460_s9 = int_to_ptr.vmem [resolvable:$false] %s2459_s9 }
  0x1b   : > { %s2461_s15 = scalar_lea.vmem %s2460_s9, 4096  ;;  %p2462_p9 = scmp.lt.s32.totalorder %s2569_s26, %s2460_s9 }
  0x1c   : > { %p2457_p10 = pnand %p2455_p6, %p2441_p11  ;;  %p2463_p0 = scmp.lt.s32.totalorder %s2461_s15, %s2454_s7 }
  0x1e   : > { %p2458_p12 = pneg %p2457_p10  ;;  %p2464_p1 = por %p2463_p0, %p2462_p9 }
  0x20   : > { %p2465_p2 = pnand %p2464_p1, %p2458_p12 }
  0x22   : > { %2468 = shalt.err (!%p2465_p2)
}
  0x23   : > { %s2506_s16 = smov 128   ;;  %s2507_s19 = smov 8  }
  0x24   : > { %2403 = dma.hbm_to_vmem [thread:$0]  (!%p2571_p8), %s2567_s24, 2048, %s2569_s26, %s2576_s28, %s2506_s16, %s2506_s16, %s2507_s19  }
  0x25   : > { %p128_p11 = scmp.lt.s32.totalorder %s2503_s12, 3  ;;  %p3286_p13 = scmp.ge.s32.totalorder %s2503_s12, 1 }
  0x27   : > { %p129_p3 = pnand %p3286_p13, %p128_p11 }
  0x29   : > { %132 = sbr.rel (%p129_p3) target bundleno = 402 (0x192), region = 28 }
  0x30   : > { %s134_s20 = sand.u32 1, %s2495_s10  }
  0x31   : > { %s1592_s21 = sshll.u32 %s134_s20, 7  ;;  %s135_s22 = scalar_lea.sflag [#allocation3], %s134_s20 }
  0x32   : > { %s2608_s23 = scalar_lea.vmem [#allocation2], %s1592_s21 }
  0x33   : > { %2486 = dma.done.wait (%p2558_p7), %s135_s22, 2048  }
  0x34   : > { %2488 = vsyncadd (%p2558_p7), %s135_s22, 4294965248  ;;  %v182_v0 = vld [vmem:[%s3240_s1] sm:$0xff]  ;;  %v183_v1 = vld [vmem:[%s3240_s1 + $0x8] sm:$0xff]  ;;  %vm1500_vm0 = vcmask 31744  }
  0x35   : > { %v184_v2 = vld [vmem:[%s3240_s1 + $0x10] sm:$0xff]  ;;  %v199_v3 = vand.u32 4294901760, %v182_v0  ;;  %v202_v4 = vand.u32 4294901760, %v183_v1  ;;  %v185_v5 = vld [vmem:[%s3240_s1 + $0x18] sm:$0xff]  ;;  %v2629_v7 = vld [vmem:[%s3240_s1 + $0x20] sm:$0xff] }
  0x36   : > { %v205_v6 = vand.u32 4294901760, %v184_v2  ;;  %v2634_v8 = vld [vmem:[%s3240_s1 + $0x28] sm:$0xff]  ;;  %v208_v9 = vand.u32 4294901760, %v185_v5  ;;  %v211_v11 = vand.u32 4294901760, %v2629_v7  ;;  %v2645_v14 = vld [vmem:[%s3240_s1 + $0x30] sm:$0xff]  ;;  %v2650_v15 = vld [vmem:[%s3240_s1 + $0x38] sm:$0xff] }
  0x37   : > { %v2636_v10 = vpack.c.bf16 %v202_v4, %v199_v3  ;;  %v214_v12 = vand.u32 4294901760, %v2634_v8  ;;  %v166_v16 = vld [vmem:[%s2608_s23] sm:$0xff]  ;;  %v217_v19 = vand.u32 4294901760, %v2645_v14  ;;  %v220_v20 = vand.u32 4294901760, %v2650_v15  ;;  %v167_v21 = vld [vmem:[%s2608_s23 + $0x8] sm:$0xff]  ;;  %v2701_v30 = vld [vmem:[%s3240_s1 + $0x50] sm:$0xff] }
  0x38   : > { %v2640_v13 = vpack.c.bf16 %v208_v9, %v205_v6  ;;  %v2657_v17 = vand.u32 4294901760, %v166_v16  ;;  %v2673_v22 = vld [vmem:[%s3240_s1 + $0x40] sm:$0xff]  ;;  %v2678_v23 = vld [vmem:[%s3240_s1 + $0x48] sm:$0xff]  ;;  %v2686_v26 = vand.u32 4294901760, %v167_v21  ;;  %v168_v31 = vld [vmem:[%s2608_s23 + $0x10] sm:$0xff]  ;;  %v2711_v35 = vsub.f32 %v182_v0, %v199_v3 }
  0x39   : > { %2127 = vmatprep.subr.bf16.mxu1 %v2636_v10  ;;  %2223 = vmatprep.subr.bf16.mxu0 %v2636_v10  ;;  %v2665_v18 = vpack.c.bf16 %v214_v12, %v211_v11  ;;  %v2694_v27 = vpack.c.bf16 %v220_v20, %v217_v19  ;;  %v223_v28 = vand.u32 4294901760, %v2673_v22  ;;  %v3250_v29 = vand.u32 4294901760, %v2678_v23  ;;  %v2707_v32 = vld [vmem:[%s3240_s1 + $0x58] sm:$0xff]  ;;  %v2721_v38 = vld [vmem:[%s3240_s1 + $0x60] sm:$0xff]  ;;  %v2726_v39 = vld [vmem:[%s3240_s1 + $0x68] sm:$0xff] }
  0x3a   : > { %2129 = vmatpush3.bf16.msra.mxu1 %v2636_v10  ;;  %2225 = vmatpush3.bf16.msra.mxu0 %v2636_v10  ;;  %v2681_v24 = vsub.f32 %v166_v16, %v2657_v17  ;;  %v169_v34 = vld [vmem:[%s2608_s23 + $0x18] sm:$0xff]  ;;  %v2713_v36 = vsub.f32 %v183_v1, %v202_v4  ;;  %v3249_v37 = vand.u32 4294901760, %v2701_v30  ;;  %v2729_v41 = vsub.f32 %v167_v21, %v2686_v26  ;;  %v2745_v45 = vld [vmem:[%s3240_s1 + $0x70] sm:$0xff]  ;;  %v170_v50 = vld [vmem:[%s2608_s23 + $0x20] sm:$0xff] }
  0x3b   : > { %2131 = vmatprep.subr.bf16.mxu1 %v2640_v13  ;;  %2227 = vmatprep.subr.bf16.mxu0 %v2640_v13  ;;  %3288 = vst [vmem:[#allocation6_spill] sm:$0xff] %v2694_v27  ;;  %v2731_v42 = vand.u32 4294901760, %v168_v31  ;;  %v2739_v43 = vpack.c.bf16 %v3250_v29, %v223_v28  ;;  %v3247_v44 = vand.u32 4294901760, %v2707_v32  ;;  %v2750_v46 = vld [vmem:[%s3240_s1 + $0x78] sm:$0xff]  ;;  %v2752_v47 = vand.u32 4294901760, %v169_v34  ;;  %v171_v55 = vld [vmem:[%s2608_s23 + $0x28] sm:$0xff] }
  0x3c   : > { %3287 = vst [vmem:[#allocation5_spill] sm:$0xff] %v2681_v24  ;;  %v281_v25 = vand.u32 4294901760, %v2681_v24  ;;  %3289 = vst [vmem:[#allocation7_spill] sm:$0xff] %v2729_v41  ;;  %v2754_v48 = vsub.f32 %v184_v2, %v205_v6  ;;  %v2756_v49 = vsub.f32 %v185_v5, %v208_v9  ;;  %v3245_v51 = vand.u32 4294901760, %v2721_v38  ;;  %v172_v2 = vld [vmem:[%s2608_s23 + $0x30] sm:$0xff]  ;;  %v173_v9 = vld [vmem:[%s2608_s23 + $0x38] sm:$0xff] }
  0x3d   : > { %3290 = vst [vmem:[#allocation8_spill] sm:$0xff] %v2739_v43  ;;  %v3244_v52 = vand.u32 4294901760, %v2726_v39  ;;  %v442_v53 = vand.u32 4294901760, %v2711_v35  ;;  %v449_v54 = vand.u32 4294901760, %v2713_v36  ;;  %v3243_v56 = vand.u32 4294901760, %v2745_v45 }
  0x3e   : > { %2133 = vmatpush3.bf16.msra.mxu1 %v2640_v13  ;;  %2229 = vmatpush3.bf16.msra.mxu0 %v2640_v13  ;;  %v282_v33 = vsub.f32 %v2681_v24, %v281_v25  ;;  %v3242_v57 = vand.u32 4294901760, %v2750_v46  ;;  %v3246_v58 = vand.u32 4294901760, %v2729_v41  ;;  %v2770_v59 = vsub.f32 %v168_v31, %v2731_v42 }
  0x3f   : > { %2135 = vmatprep.subr.bf16.mxu1 %v2665_v18  ;;  %2231 = vmatprep.subr.bf16.mxu0 %v2665_v18  ;;  %v2778_v60 = vpack.c.bf16 %v3247_v44, %v3249_v37  ;;  %v2781_v61 = vsub.f32 %v169_v34, %v2752_v47  ;;  %v456_v62 = vand.u32 4294901760, %v2754_v48  ;;  %v2784_v63 = vand.u32 4294901760, %v170_v50 }
  0x40   : > { %1990 = vmatprep.mubr.f32.mxu0 %v281_v25  ;;  %v283_v40 = vand.u32 4294901760, %v282_v33  ;;  %3291 = vst [vmem:[#allocation9_spill] sm:$0xff] %v2770_v59  ;;  %v463_v0 = vand.u32 4294901760, %v2756_v49  ;;  %v2787_v1 = vand.u32 4294901760, %v171_v55  ;;  %v443_v3 = vsub.f32 %v2711_v35, %v442_v53 }
  0x41   : > { %3292 = vst [vmem:[#allocation10_spill] sm:$0xff] %v2778_v60  ;;  %3293 = vst [vmem:[#allocation11_spill] sm:$0xff] %v2781_v61  ;;  %v450_v4 = vsub.f32 %v2713_v36, %v449_v54  ;;  %v2795_v5 = vsub.f32 %v2629_v7, %v211_v11  ;;  %v2800_v6 = vsub.f32 %v2634_v8, %v214_v12  ;;  %v3248_v11 = vand.u32 4294901760, %v2770_v59 }
  0x42   : > { %2137 = vmatpush3.bf16.msra.mxu1 %v2665_v18  ;;  %2233 = vmatpush3.bf16.msra.mxu0 %v2665_v18  ;;  %v2809_v16 = vpack.c.bf16 %v3244_v52, %v3245_v51  ;;  %v2815_v7 = vpack.c.bf16 %v3242_v57, %v3243_v56  ;;  %v2820_v8 = vsub.f32 %v2729_v41, %v3246_v58  ;;  %v3251_v12 = vand.u32 4294901760, %v2781_v61 }
  0x43   : > { %2139 = vmatprep.subr.bf16.mxu1 %v2694_v27  ;;  %2235 = vmatprep.subr.bf16.mxu0 %v2694_v27  ;;  %v457_v21 = vsub.f32 %v2754_v48, %v456_v62  ;;  %v2828_v25 = vsub.f32 %v170_v50, %v2784_v63  ;;  %v2830_v31 = vand.u32 4294901760, %v172_v2  ;;  %v464_v33 = vsub.f32 %v2756_v49, %v463_v0 }
  0x44   : > { %1822 = vmatprep.mubr.f32.mxu1 %v283_v40  ;;  %3294 = vst [vmem:[#allocation12_spill] sm:$0xff] %v2809_v16  ;;  %3295 = vst [vmem:[#allocation13_spill] sm:$0xff] %v2815_v7  ;;  %v2834_v34 = vsub.f32 %v171_v55, %v2787_v1  ;;  %v2836_v40 = vand.u32 4294901760, %v173_v9  ;;  %v2841_v57 = vsub.f32 %v2645_v14, %v217_v19  ;;  %v444_v56 = vand.u32 4294901760, %v443_v3  ;;  %v174_v19 = vld [vmem:[%s2608_s23 + $0x40] sm:$0xff] }
  0x45   : > { %3296 = vst [vmem:[#allocation14_spill] sm:$0xff] %v2828_v25  ;;  %3297 = vst [vmem:[#allocation15_spill] sm:$0xff] %v2830_v31  ;;  %v451_v52 = vand.u32 4294901760, %v450_v4  ;;  %v470_v50 = vand.u32 4294901760, %v2795_v5  ;;  %v477_v51 = vand.u32 4294901760, %v2800_v6  ;;  %v293_v55 = vand.u32 4294901760, %v2820_v8 }
  0x46   : > { %2141 = vmatpush3.bf16.msra.mxu1 %v2694_v27  ;;  %2237 = vmatpush3.bf16.msra.mxu0 %v2694_v27  ;;  %3298 = vst [vmem:[#allocation16_spill] sm:$0xff] %v2834_v34  ;;  %3299 = vst [vmem:[#allocation17_spill] sm:$0xff] %v2836_v40  ;;  %v2848_v58 = vpack.c.bf16 %v449_v54, %v442_v53  ;;  %v2853_v44 = vsub.f32 %v2770_v59, %v3248_v11  ;;  %v458_v54 = vand.u32 4294901760, %v457_v21 }
  0x47   : > { %2143 = vmatprep.subr.bf16.mxu1 %v2739_v43  ;;  %2239 = vmatprep.subr.bf16.mxu0 %v2739_v43  ;;  %v2858_v14 = vsub.f32 %v2650_v15, %v220_v20  ;;  %v2866_v53 = vsub.f32 %v2781_v61, %v3251_v12  ;;  %v3259_v3 = vand.u32 4294901760, %v2828_v25  ;;  %v2870_v4 = vsub.f32 %v172_v2, %v2830_v31 }
  0x48   : > { %v465_v8 = vand.u32 4294901760, %v464_v33  ;;  %v2874_v20 = vsub.f32 %v173_v9, %v2836_v40  ;;  %v2158_v37 = vpack.c.bf16 %v451_v52, %v444_v56  ;;  %v471_v29 = vsub.f32 %v2795_v5, %v470_v50  ;;  %v175_v9 = vld [vmem:[%s2608_s23 + $0x48] sm:$0xff] }
  0x49   : > { %3300 = vst [vmem:[#allocation18_spill] sm:$0xff] %v2870_v4  ;;  %v478_v12 = vsub.f32 %v2800_v6, %v477_v51  ;;  %v2879_v21 = vand.u32 4294901760, %v174_v19  ;;  %v303_v2 = vand.u32 4294901760, %v2853_v44  ;;  %v491_v33 = vand.u32 4294901760, %v2858_v14 }
  0x4a   : > { %2145 = vmatpush3.bf16.msra.mxu1 %v2739_v43  ;;  %2241 = vmatpush3.bf16.msra.mxu0 %v2739_v43  ;;  %3301 = vst [vmem:[#allocation19_spill] sm:$0xff] %v2874_v20  ;;  %v2889_v52 = vsub.f32 %v2673_v22, %v223_v28  ;;  %v3303_v56 = vand.u32 4294901760, %v2678_v23  ;;  %v313_v15 = vand.u32 4294901760, %v2866_v53  ;;  %v2258_v44 = vpack.c.bf16 %v463_v0, %v456_v62  ;;  %v176_v28 = vld [vmem:[%s2608_s23 + $0x50] sm:$0xff] }
  0x4b   : > { %2147 = vmatprep.subr.bf16.mxu1 %v2778_v60  ;;  %2243 = vmatprep.subr.bf16.mxu0 %v2778_v60  ;;  %3302 = vst [vmem:[#allocation20_spill] sm:$0xff] %v2879_v21  ;;  %v2902_v24 = vsub.f32 %v2828_v25, %v3259_v3  ;;  %v3305_v53 = vand.u32 4294901760, %v2841_v57  ;;  %v472_v0 = vand.u32 4294901760, %v471_v29  ;;  %v479_v43 = vand.u32 4294901760, %v478_v12  ;;  %v177_v29 = vld [vmem:[%s2608_s23 + $0x58] sm:$0xff] }
  0x4c   : > { %v2894_v11 = vsub.f32 %v2678_v23, %v3303_v56  ;;  %v3304_v23 = vand.u32 4294901760, %v2834_v34  ;;  %v2916_v3 = vsub.f32 %v174_v19, %v2879_v21  ;;  %v2918_v22 = vand.u32 4294901760, %v175_v9 }
  0x4d   : > { %v485_v62 = vsub.f32 %v2841_v57, %v3305_v53  ;;  %v323_v12 = vand.u32 4294901760, %v2902_v24  ;;  %v2930_v19 = vpack.c.bf16 %v477_v51, %v470_v50  ;;  %v3306_v53 = vand.u32 4294901760, %v2870_v4 }
  0x4e   : > { %2149 = vmatpush3.bf16.msra.mxu1 %v2778_v60  ;;  %2245 = vmatpush3.bf16.msra.mxu0 %v2778_v60  ;;  %v2909_v56 = vsub.f32 %v2834_v34, %v3304_v23  ;;  %v2925_v60 = vand.u32 4294901760, %v176_v28  ;;  %v3307_v21 = vand.u32 4294901760, %v2701_v30  ;;  %v3308_v40 = vand.u32 4294901760, %v2874_v20 }
  0x4f   : > { %2151 = vmatprep.subr.bf16.mxu1 %v2809_v16  ;;  %2247 = vmatprep.subr.bf16.mxu0 %v2809_v16  ;;  %v486_v24 = vand.u32 4294901760, %v485_v62  ;;  %v3309_v51 = vand.u32 4294901760, %v2707_v32  ;;  %v3310_v31 = vand.u32 4294901760, %v2729_v41 }
  0x50   : > { %v333_v23 = vand.u32 4294901760, %v2909_v56  ;;  %v2946_v27 = vsub.f32 %v2874_v20, %v3308_v40  ;;  %v2958_v56 = vsub.f32 %v175_v9, %v2918_v22  ;;  %v2960_v40 = vand.u32 4294901760, %v177_v29  ;;  %v179_v9 = vld [vmem:[%s2608_s23 + $0x68] sm:$0xff] }
  0x51   : > { %v2951_v50 = vsub.f32 %v2707_v32, %v3309_v51  ;;  %v3311_v32 = vand.u32 4294901760, %v2889_v52 }
  0x52   : > { %2153 = vmatpush3.bf16.msra.mxu1 %v2809_v16  ;;  %2249 = vmatpush3.bf16.msra.mxu0 %v2809_v16  ;;  %v2162_v16 = vpack.c.bf16 %v465_v8, %v458_v54  ;;  %v492_v54 = vsub.f32 %v2858_v14, %v491_v33  ;;  %v2940_v8 = vsub.f32 %v2701_v30, %v3307_v21 }
  0x53   : > { %2155 = vmatprep.subr.bf16.mxu1 %v2815_v7  ;;  %2251 = vmatprep.subr.bf16.mxu0 %v2815_v7  ;;  %v2166_v30 = vpack.c.bf16 %v479_v43, %v472_v0  ;;  %v499_v51 = vsub.f32 %v2889_v52, %v3311_v32  ;;  %v3313_v0 = vand.u32 4294901760, %v2770_v59  ;;  %v3314_v32 = vand.u32 4294901760, %v2721_v38  ;;  %v180_v59 = vld [vmem:[%s2608_s23 + $0x70] sm:$0xff] }
  0x54   : > { %v493_v62 = vand.u32 4294901760, %v492_v54 }
  0x55   : > { %v2982_v21 = vsub.f32 %v2721_v38, %v3314_v32  ;;  %v3317_v38 = vand.u32 4294901760, %v2781_v61  ;;  %v3318_v32 = vand.u32 4294901760, %v2916_v3  ;;  %v181_v61 = vld [vmem:[%s2608_s23 + $0x78] sm:$0xff] }
  0x56   : > { %2157 = vmatpush3.bf16.msra.mxu1 %v2815_v7  ;;  %2253 = vmatpush3.bf16.msra.mxu0 %v2815_v7  ;;  %v2935_v7 = vsub.f32 %v2870_v4, %v3306_v53  ;;  %v178_v53 = vld [vmem:[%s2608_s23 + $0x60] sm:$0xff]  ;;  %s1593_s23 = sshll.u32 %s1584_s13, 4 }
  0x57   : > { %2159 = vmatprep.subr.bf16.mxu1 %v2158_v37  ;;  %2255 = vmatprep.subr.bf16.mxu0 %v2848_v58  ;;  %v2977_v54 = vand.u32 4294901760, %v178_v53  ;;  %p161_p7 = scmp.lt.s32.totalorder %s1593_s23, 31 }
  0x59   : > { %1823 = vmatmul.mubr.f32.vlgmr.msra.gmra.mrb[0].mxu1 %v293_v55  ;;  %1991 = vmatmul.mubr.f32.vlgmr.msra.gmra.mrb[0].mxu0 %v3310_v31  ;;  %v3312_v55 = vand.u32 4294901760, %v2894_v11  ;;  %v2970_v31 = vsub.f32 %v176_v28, %v2925_v60  ;;  %v353_v28 = vand.u32 4294901760, %v2946_v27  ;;  %v362_v27 = vsub.f32 %v2916_v3, %v3318_v32  ;;  %s3369_s23 = smov (!%p161_p7, %s1593_s23), 31 }
  0x5a   : > { %2161 = vmatpush3.bf16.msra.mxu1 %v2158_v37  ;;  %2257 = vmatpush3.bf16.msra.mxu0 %v2848_v58  ;;  %v343_v37 = vand.u32 4294901760, %v2935_v7  ;;  %v3316_v7 = vand.u32 4294901760, %v2726_v39  ;;  %v3322_v32 = vand.u32 4294901760, %v2940_v8  ;;  %s1594_s6 = sshll.u32 %s3369_s23, 3 }
  0x5b   : > { %v506_v43 = vsub.f32 %v2894_v11, %v3312_v55  ;;  %1825 = vmatprep.mubr.f32.mxu1 %v303_v2  ;;  %1993 = vmatprep.mubr.f32.mxu0 %v3313_v0  ;;  %v3315_v2 = vand.u32 4294901760, %v2841_v57  ;;  %s3192_s9 = scalar_lea.vmem %s3241_s2, %s1594_s6 }
  0x5c   : > { %2163 = vmatprep.subr.bf16.mxu1 %v2162_v16  ;;  %2259 = vmatprep.subr.bf16.mxu0 %v2258_v44  ;;  %v2991_v58 = vsub.f32 %v2726_v39, %v3316_v7  ;;  %v2170_v39 = vpack.c.bf16 %v493_v62, %v486_v24  ;;  %v500_v7 = vand.u32 4294901760, %v499_v51  ;;  %v513_v41 = vsub.f32 %v2940_v8, %v3322_v32 }
  0x5d   : > { %v2266_v55 = vpack.c.bf16 %v491_v33, %v3315_v2  ;;  %1826 = vmatmul.mubr.f32.gmra.mrb[2].mxu1 %v313_v15  ;;  %1994 = vmatmul.mubr.f32.gmra.mrb[2].mxu0 %v3317_v38  ;;  %v3001_v33 = vsub.f32 %v177_v29, %v2960_v40  ;;  %v3003_v2 = vand.u32 4294901760, %v179_v9  ;;  %v507_v0 = vand.u32 4294901760, %v506_v43 }
  0x5e   : > { %2165 = vmatpush3.bf16.msra.mxu1 %v2162_v16  ;;  %2261 = vmatpush3.bf16.msra.mxu0 %v2258_v44  ;;  %v3321_v38 = vand.u32 4294901760, %v2828_v25  ;;  %v3013_v29 = vsub.f32 %v178_v53, %v2977_v54  ;;  %v3016_v44 = vand.u32 4294901760, %v180_v59  ;;  %v3325_v24 = vand.u32 4294901760, %v2951_v50 }
  0x5f   : > { %3319 = vst [vmem:[#allocation21_spill] sm:$0xff] %v3001_v33  ;;  %3320 = vst [vmem:[#allocation22_spill] sm:$0xff] %v3003_v2  ;;  %1828 = vmatprep.mubr.f32.mxu1 %v323_v12  ;;  %2167 = vmatprep.subr.bf16.mxu1 %v2166_v30  ;;  %v533_v62 = vand.u32 4294901760, %v2991_v58  ;;  %v3326_v51 = vand.u32 4294901760, %v2745_v45  ;;  %v3327_v53 = vand.u32 4294901760, %v2750_v46  ;;  %v3328_v32 = vand.u32 4294901760, %v2834_v34 }
  0x60   : > { %1996 = vmatprep.mubr.f32.mxu0 %v3321_v38  ;;  %3323 = vst [vmem:[#allocation23_spill] sm:$0xff] %v3013_v29  ;;  %3324 = vst [vmem:[#allocation24_spill] sm:$0xff] %v3016_v44  ;;  %2263 = vmatprep.subr.bf16.mxu0 %v2930_v19  ;;  %v520_v12 = vsub.f32 %v2951_v50, %v3325_v24  ;;  %v3329_v16 = vand.u32 4294901760, %v2958_v56  ;;  %v391_v15 = vand.u32 4294901760, %v3001_v33  ;;  %v3333_v34 = vand.u32 4294901760, %v2970_v31 }
  0x61   : > { %v3026_v43 = vsub.f32 %v2745_v45, %v3326_v51  ;;  %v3031_v38 = vsub.f32 %v2750_v46, %v3327_v53  ;;  %1829 = vmatmul.mubr.f32.gmra.mrb[4].mxu1 %v333_v23  ;;  %1997 = vmatmul.mubr.f32.gmra.mrb[4].mxu0 %v3328_v32  ;;  %v3040_v25 = vsub.f32 %v179_v9, %v3003_v2  ;;  %v3042_v45 = vand.u32 4294901760, %v181_v61 }
  0x62   : > { %v372_v24 = vsub.f32 %v2958_v56, %v3329_v16  ;;  %2169 = vmatpush3.bf16.msra.mxu1 %v2166_v30  ;;  %2265 = vmatpush3.bf16.msra.mxu0 %v2930_v19  ;;  %v363_v46 = vand.u32 4294901760, %v362_v27  ;;  %v2174_v51 = vpack.c.bf16 %v507_v0, %v500_v7  ;;  %v3331_v23 = vand.u32 4294901760, %v2889_v52 }
  0x63   : > { %3330 = vst [vmem:[#allocation25_spill] sm:$0xff] %v3040_v25  ;;  %v3332_v53 = vand.u32 4294901760, %v2894_v11  ;;  %v382_v16 = vsub.f32 %v2970_v31, %v3333_v34  ;;  %1831 = vmatprep.mubr.f32.mxu1 %v343_v37  ;;  %v3334_v9 = vand.u32 4294901760, %v2870_v4  ;;  %v514_v2 = vand.u32 4294901760, %v513_v41  ;;  %2171 = vmatprep.subr.bf16.mxu1 %v2170_v39 }
  0x64   : > { %v401_v30 = vand.u32 4294901760, %v3013_v29  ;;  %v3335_v19 = vand.u32 4294901760, %v2982_v21  ;;  %v3059_v27 = vsub.f32 %v180_v59, %v3016_v44  ;;  %2267 = vmatprep.subr.bf16.mxu0 %v2266_v55  ;;  %v521_v7 = vand.u32 4294901760, %v520_v12 }
  0x65   : > { %v2270_v32 = vpack.c.bf16 %v3332_v53, %v3331_v23  ;;  %1999 = vmatprep.mubr.f32.mxu0 %v3334_v9  ;;  %v534_v23 = vsub.f32 %v2991_v58, %v533_v62  ;;  %v540_v34 = vand.u32 4294901760, %v3026_v43  ;;  %v547_v37 = vand.u32 4294901760, %v3031_v38  ;;  %1832 = vmatmul.mubr.f32.gmra.mrb[6].mxu1 %v353_v28 }
  0x66   : > { %v527_v0 = vsub.f32 %v2982_v21, %v3335_v19  ;;  %v3336_v41 = vand.u32 4294901760, %v2874_v20  ;;  %v373_v53 = vand.u32 4294901760, %v372_v24  ;;  %v392_v9 = vsub.f32 %v3001_v33, %v391_v15  ;;  %2173 = vmatpush3.bf16.msra.mxu1 %v2170_v39  ;;  %2269 = vmatpush3.bf16.msra.mxu0 %v2266_v55 }
  0x67   : > { %v411_v19 = vand.u32 4294901760, %v3040_v25  ;;  %v3069_v59 = vsub.f32 %v181_v61, %v3042_v45  ;;  %v383_v12 = vand.u32 4294901760, %v382_v16  ;;  %1834 = vmatprep.mubr.f32.mxu1 %v363_v46  ;;  %v3337_v4 = vand.u32 4294901760, %v2916_v3  ;;  %2175 = vmatprep.subr.bf16.mxu1 %v2174_v51 }
  0x68   : > { %2000 = vmatmul.mubr.f32.gmra.mrb[6].mxu0 %v3336_v41  ;;  %v3338_v28 = vand.u32 4294901760, %v2940_v8  ;;  %v3339_v20 = vand.u32 4294901760, %v2951_v50  ;;  %v402_v24 = vsub.f32 %v3013_v29, %v401_v30  ;;  %v528_v33 = vand.u32 4294901760, %v527_v0  ;;  %2271 = vmatprep.subr.bf16.mxu0 %v2270_v32 }
  0x69   : > { %2002 = vmatprep.mubr.f32.mxu0 %v3337_v4  ;;  %v421_v44 = vand.u32 4294901760, %v3059_v27  ;;  %v2178_v61 = vpack.c.bf16 %v521_v7, %v514_v2  ;;  %v535_v39 = vand.u32 4294901760, %v534_v23  ;;  %v541_v55 = vsub.f32 %v3026_v43, %v540_v34  ;;  %1835 = vmatmul.mubr.f32.gmra.mrb[8].mxu1 %v373_v53 }
  0x6a   : > { %v2274_v41 = vpack.c.bf16 %v3339_v20, %v3338_v28  ;;  %v548_v46 = vsub.f32 %v3031_v38, %v547_v37  ;;  %v3340_v4 = vand.u32 4294901760, %v2958_v56  ;;  %v393_v16 = vand.u32 4294901760, %v392_v9  ;;  %2177 = vmatpush3.bf16.msra.mxu1 %v2174_v51  ;;  %2273 = vmatpush3.bf16.msra.mxu0 %v2270_v32 }
  0x6b   : > { %v412_v20 = vsub.f32 %v3040_v25, %v411_v19  ;;  %v431_v28 = vand.u32 4294901760, %v3069_v59  ;;  %1837 = vmatprep.mubr.f32.mxu1 %v383_v12  ;;  %v3341_v0 = vand.u32 4294901760, %v2970_v31  ;;  %v403_v2 = vand.u32 4294901760, %v402_v24  ;;  %2179 = vmatprep.subr.bf16.mxu1 %v2178_v61 }
  0x6c   : > { %2003 = vmatmul.mubr.f32.gmra.mrb[8].mxu0 %v3340_v4  ;;  %v422_v7 = vsub.f32 %v3059_v27, %v421_v44  ;;  %2275 = vmatprep.subr.bf16.mxu0 %v2274_v41  ;;  %v2182_v23 = vpack.c.bf16 %v535_v39, %v528_v33  ;;  %v3342_v53 = vand.u32 4294901760, %v2982_v21  ;;  %v542_v9 = vand.u32 4294901760, %v541_v55 }
  0x6d   : > { %2005 = vmatprep.mubr.f32.mxu0 %v3341_v0  ;;  %v549_v29 = vand.u32 4294901760, %v548_v46  ;;  %1838 = vmatmul.mubr.f32.gmra.mrb[10].mxu1 %v393_v16  ;;  %v413_v25 = vand.u32 4294901760, %v412_v20  ;;  %v432_v51 = vsub.f32 %v3069_v59, %v431_v28  ;;  %v2282_v24 = vpack.c.bf16 %v547_v37, %v540_v34 }
  0x6e   : > { %v2278_v4 = vpack.c.bf16 %v533_v62, %v3342_v53  ;;  %2181 = vmatpush3.bf16.msra.mxu1 %v2178_v61  ;;  %2277 = vmatpush3.bf16.msra.mxu0 %v2274_v41  ;;  %v423_v32 = vand.u32 4294901760, %v422_v7  ;;  %v3356_v62 = vld [vmem:[#allocation11_spill] sm:$0xff] }
  0x6f   : > { %1840 = vmatprep.mubr.f32.mxu1 %v403_v2  ;;  %2183 = vmatprep.subr.bf16.mxu1 %v2182_v23  ;;  %v2186_v12 = vpack.c.bf16 %v549_v29, %v542_v9  ;;  %v433_v33 = vand.u32 4294901760, %v432_v51  ;;  %v3354_v29 = vld [vmem:[#allocation7_spill] sm:$0xff] }
  0x70   : > { %2006 = vmatmul.mubr.f32.gmra.mrb[10].mxu0 %v391_v15  ;;  %2279 = vmatprep.subr.bf16.mxu0 %v2278_v4  ;;  %v2190_v15 = vpack.c.bf16 %v2713_v36, %v2711_v35  ;;  %v2198_v35 = vpack.c.bf16 %v2800_v6, %v2795_v5  ;;  %v3343_v36 = vld [vmem:[#allocation15_spill] sm:$0xff]  ;;  %v2210_v5 = vpack.c.bf16 %v2951_v50, %v2940_v8  ;;  %v3348_v6 = vld [vmem:[#allocation10_spill] sm:$0xff]  ;;  %v3351_v50 = vld [vmem:[#allocation24_spill] sm:$0xff] }
  0x71   : > { %2008 = vmatprep.mubr.f32.mxu0 %v401_v30  ;;  %1841 = vmatmul.mubr.f32.gmra.mrb[12].mxu1 %v413_v25  ;;  %v2194_v25 = vpack.c.bf16 %v2756_v49, %v2754_v48  ;;  %v2206_v48 = vpack.c.bf16 %v2894_v11, %v2889_v52  ;;  %v3345_v49 = vld [vmem:[#allocation17_spill] sm:$0xff]  ;;  %v2214_v11 = vpack.c.bf16 %v2991_v58, %v2982_v21  ;;  %v3350_v8 = vld [vmem:[#allocation22_spill] sm:$0xff] }
  0x72   : > { %2185 = vmatpush3.bf16.msra.mxu1 %v2182_v23  ;;  %2281 = vmatpush3.bf16.msra.mxu0 %v2278_v4  ;;  %v2218_v52 = vpack.c.bf16 %v3031_v38, %v3026_v43  ;;  %v3352_v21 = vld [vmem:[#allocation13_spill] sm:$0xff]  ;;  %v3357_v43 = vld [vmem:[#allocation14_spill] sm:$0xff]  ;;  %v3358_v38 = vld [vmem:[#allocation16_spill] sm:$0xff] }
  0x73   : > { %1843 = vmatprep.mubr.f32.mxu1 %v423_v32  ;;  %2187 = vmatprep.subr.bf16.mxu1 %v2186_v12  ;;  %v3353_v58 = vld [vmem:[#allocation5_spill] sm:$0xff] }
  0x74   : > { %2009 = vmatmul.mubr.f32.gmra.mrb[12].mxu0 %v411_v19  ;;  %2283 = vmatprep.subr.bf16.mxu0 %v2282_v24 }
  0x75   : > { %2011 = vmatprep.mubr.f32.mxu0 %v421_v44  ;;  %1844 = vmatmul.mubr.f32.gmra.mrb[14].mxu1 %v433_v33  ;;  %v3355_v44 = vld [vmem:[#allocation9_spill] sm:$0xff] }
  0x76   : > { %2189 = vmatpush3.bf16.msra.mxu1 %v2186_v12  ;;  %2285 = vmatpush3.bf16.msra.mxu0 %v2282_v24 }
  0x77   : > { %1878 = vmatprep.mubr.f32.mxu1 %v2657_v17  ;;  %2191 = vmatprep.subr.bf16.mxu1 %v2190_v15 }
  0x78   : > { %2012 = vmatmul.mubr.f32.gmra.mrb[14].mxu0 %v431_v28  ;;  %2287 = vmatprep.subr.bf16.mxu0 %v2636_v10 }
  0x79   : > { %2046 = vmatprep.mubr.f32.mxu0 %v2657_v17  ;;  %1879 = vmatmul.mubr.f32.vlgmr.msra.gmra.mrb[0].mxu1 %v2686_v26 }
  0x7a   : > { %2193 = vmatpush3.bf16.msra.mxu1 %v2190_v15  ;;  %1881 = vmatprep.mubr.f32.mxu1 %v2731_v42 }
  0x7b   : > { %2195 = vmatprep.subr.bf16.mxu1 %v2194_v25 }
  0x7c   : > { %2047 = vmatmul.mubr.f32.vlgmr.msra.gmra.mrb[0].mxu0 %v2686_v26 }
  0x7d   : > { %2289 = vmatpush3.bf16.msra.mxu0 %v2636_v10  ;;  %2049 = vmatprep.mubr.f32.mxu0 %v2731_v42  ;;  %v2202_v10 = vpack.c.bf16 %v2858_v14, %v2841_v57  ;;  %v3346_v57 = vld [vmem:[#allocation20_spill] sm:$0xff] }
  0x7e   : > { %2291 = vmatprep.subr.bf16.mxu0 %v2640_v13  ;;  %1882 = vmatmul.mubr.f32.gmra.mrb[2].mxu1 %v2752_v47  ;;  %v3349_v14 = vld [vmem:[#allocation12_spill] sm:$0xff] }
  0x7f   : > { %2197 = vmatpush3.bf16.msra.mxu1 %v2194_v25  ;;  %1884 = vmatprep.mubr.f32.mxu1 %v2784_v63 }
  0x80   : > { %2050 = vmatmul.mubr.f32.gmra.mrb[2].mxu0 %v2752_v47  ;;  %2199 = vmatprep.subr.bf16.mxu1 %v2198_v35 }
  0x81   : > { %2293 = vmatpush3.bf16.msra.mxu0 %v2640_v13  ;;  %2052 = vmatprep.mubr.f32.mxu0 %v2784_v63  ;;  %v3344_v13 = vld [vmem:[#allocation6_spill] sm:$0xff] }
  0x82   : > { %2295 = vmatprep.subr.bf16.mxu0 %v2665_v18  ;;  %1885 = vmatmul.mubr.f32.gmra.mrb[4].mxu1 %v2787_v1 }
  0x83   : > { %2201 = vmatpush3.bf16.msra.mxu1 %v2198_v35  ;;  %1887 = vmatprep.mubr.f32.mxu1 %v3343_v36 }
  0x84   : > { %2053 = vmatmul.mubr.f32.gmra.mrb[4].mxu0 %v2787_v1  ;;  %2203 = vmatprep.subr.bf16.mxu1 %v2202_v10 }
  0x85   : > { %2297 = vmatpush3.bf16.msra.mxu0 %v2665_v18  ;;  %2055 = vmatprep.mubr.f32.mxu0 %v3343_v36  ;;  %v3347_v18 = vld [vmem:[#allocation8_spill] sm:$0xff] }
  0x86   : > { %2299 = vmatprep.subr.bf16.mxu0 %v3344_v13  ;;  %1888 = vmatmul.mubr.f32.gmra.mrb[6].mxu1 %v3345_v49 }
  0x87   : > { %2205 = vmatpush3.bf16.msra.mxu1 %v2202_v10  ;;  %1890 = vmatprep.mubr.f32.mxu1 %v3346_v57 }
  0x88   : > { %2056 = vmatmul.mubr.f32.gmra.mrb[6].mxu0 %v3345_v49  ;;  %2207 = vmatprep.subr.bf16.mxu1 %v2206_v48 }
  0x89   : > { %2301 = vmatpush3.bf16.msra.mxu0 %v3344_v13  ;;  %2058 = vmatprep.mubr.f32.mxu0 %v3346_v57 }
  0x8a   : > { %2303 = vmatprep.subr.bf16.mxu0 %v3347_v18  ;;  %1891 = vmatmul.mubr.f32.gmra.mrb[8].mxu1 %v2918_v22 }
  0x8b   : > { %2209 = vmatpush3.bf16.msra.mxu1 %v2206_v48  ;;  %1893 = vmatprep.mubr.f32.mxu1 %v2925_v60 }
  0x8c   : > { %2059 = vmatmul.mubr.f32.gmra.mrb[8].mxu0 %v2918_v22  ;;  %2211 = vmatprep.subr.bf16.mxu1 %v2210_v5 }
  0x8d   : > { %2305 = vmatpush3.bf16.msra.mxu0 %v3347_v18  ;;  %2061 = vmatprep.mubr.f32.mxu0 %v2925_v60 }
  0x8e   : > { %2307 = vmatprep.subr.bf16.mxu0 %v3348_v6  ;;  %1894 = vmatmul.mubr.f32.gmra.mrb[10].mxu1 %v2960_v40 }
  0x8f   : > { %2213 = vmatpush3.bf16.msra.mxu1 %v2210_v5  ;;  %1896 = vmatprep.mubr.f32.mxu1 %v2977_v54 }
  0x90   : > { %2062 = vmatmul.mubr.f32.gmra.mrb[10].mxu0 %v2960_v40  ;;  %2215 = vmatprep.subr.bf16.mxu1 %v2214_v11 }
  0x91   : > { %2309 = vmatpush3.bf16.msra.mxu0 %v3348_v6  ;;  %2064 = vmatprep.mubr.f32.mxu0 %v2977_v54 }
  0x92   : > { %2311 = vmatprep.subr.bf16.mxu0 %v3349_v14  ;;  %1897 = vmatmul.mubr.f32.gmra.mrb[12].mxu1 %v3350_v8 }
  0x93   : > { %2217 = vmatpush3.bf16.msra.mxu1 %v2214_v11  ;;  %1899 = vmatprep.mubr.f32.mxu1 %v3351_v50 }
  0x94   : > { %2065 = vmatmul.mubr.f32.gmra.mrb[12].mxu0 %v3350_v8  ;;  %2219 = vmatprep.subr.bf16.mxu1 %v2218_v52 }
  0x95   : > { %2313 = vmatpush3.bf16.msra.mxu0 %v3349_v14  ;;  %2067 = vmatprep.mubr.f32.mxu0 %v3351_v50 }
  0x96   : > { %2315 = vmatprep.subr.bf16.mxu0 %v3352_v21  ;;  %1900 = vmatmul.mubr.f32.gmra.mrb[14].mxu1 %v3042_v45 }
  0x97   : > { %2221 = vmatpush3.bf16.msra.mxu1 %v2218_v52  ;;  %1934 = vmatprep.mubr.f32.mxu1 %v3353_v58 }
  0x98   : > { %2068 = vmatmul.mubr.f32.gmra.mrb[14].mxu0 %v3042_v45 }
  0x99   : > { %2317 = vmatpush3.bf16.msra.mxu0 %v3352_v21  ;;  %2102 = vmatprep.mubr.f32.mxu0 %v2657_v17  ;;  %v3359_v17 = vld [vmem:[#allocation18_spill] sm:$0xff] }
  0x9a   : > { %1935 = vmatmul.mubr.f32.vlgmr.msra.gmra.mrb[0].mxu1 %v3354_v29 }
  0x9b   : > { %1937 = vmatprep.mubr.f32.mxu1 %v3355_v44 }
  0x9c   : > { %2103 = vmatmul.mubr.f32.vlgmr.msra.gmra.mrb[0].mxu0 %v2686_v26  ;;  %v3360_v26 = vld [vmem:[#allocation19_spill] sm:$0xff] }
  0x9d   : > { %2105 = vmatprep.mubr.f32.mxu0 %v2731_v42  ;;  %v3361_v42 = vld [vmem:[#allocation21_spill] sm:$0xff] }
  0x9e   : > { %1938 = vmatmul.mubr.f32.gmra.mrb[2].mxu1 %v3356_v62 }
  0x9f   : > { %1940 = vmatprep.mubr.f32.mxu1 %v3357_v43 }
  0xa0   : > { %2106 = vmatmul.mubr.f32.gmra.mrb[2].mxu0 %v2752_v47  ;;  %v3362_v47 = vld [vmem:[#allocation23_spill] sm:$0xff] }
  0xa1   : > { %2108 = vmatprep.mubr.f32.mxu0 %v2784_v63  ;;  %v3363_v63 = vld [vmem:[#allocation25_spill] sm:$0xff] }
  0xa2   : > { %1941 = vmatmul.mubr.f32.gmra.mrb[4].mxu1 %v3358_v38 }
  0xa3   : > { %1943 = vmatprep.mubr.f32.mxu1 %v3359_v17 }
  0xa4   : > { %2109 = vmatmul.mubr.f32.gmra.mrb[4].mxu0 %v2787_v1 }
  0xa5   : > { %2111 = vmatprep.mubr.f32.mxu0 %v3343_v36 }
  0xa6   : > { %1944 = vmatmul.mubr.f32.gmra.mrb[6].mxu1 %v3360_v26 }
  0xa7   : > { %1946 = vmatprep.mubr.f32.mxu1 %v2916_v3 }
  0xa8   : > { %2112 = vmatmul.mubr.f32.gmra.mrb[6].mxu0 %v3345_v49 }
  0xa9   : > { %2114 = vmatprep.mubr.f32.mxu0 %v3346_v57 }
  0xaa   : > { %1947 = vmatmul.mubr.f32.gmra.mrb[8].mxu1 %v2958_v56 }
  0xab   : > { %1949 = vmatprep.mubr.f32.mxu1 %v2970_v31 }
  0xac   : > { %2115 = vmatmul.mubr.f32.gmra.mrb[8].mxu0 %v2918_v22 }
  0xad   : > { %2117 = vmatprep.mubr.f32.mxu0 %v2925_v60 }
  0xae   : > { %1950 = vmatmul.mubr.f32.gmra.mrb[10].mxu1 %v3361_v42 }
  0xaf   : > { %1952 = vmatprep.mubr.f32.mxu1 %v3362_v47 }
  0xb0   : > { %2118 = vmatmul.mubr.f32.gmra.mrb[10].mxu0 %v2960_v40 }
  0xb1   : > { %2120 = vmatprep.mubr.f32.mxu0 %v2977_v54 }
  0xb2   : > { %1953 = vmatmul.mubr.f32.gmra.mrb[12].mxu1 %v3363_v63 }
  0xb3   : > { %1955 = vmatprep.mubr.f32.mxu1 %v3059_v27 }
  0xb4   : > { %2121 = vmatmul.mubr.f32.gmra.mrb[12].mxu0 %v3350_v8 }
  0xb5   : > { %2123 = vmatprep.mubr.f32.mxu0 %v3351_v50 }
  0xb6   : > { %1956 = vmatmul.mubr.f32.gmra.mrb[14].mxu1 %v3069_v59 }
  0xb8   : > { %2124 = vmatmul.mubr.f32.gmra.mrb[14].mxu0 %v3042_v45 }
 0x16d   : > { %v1936_v60 = vpop.f32.mrb[0].mxu1 }
 0x16e   : > { %v780_v22 = vpop.f32.mrb[1].mxu1 }
 0x16f   : > { %v2104_v1 = vpop.f32.mrb[0].mxu0 }
 0x170   : > { %v2318_v3 = vadd.f32 %v2104_v1, %v1936_v60  ;;  %v1390_v56 = vpop.f32.mrb[1].mxu0 }
 0x171   : > { %v2319_v40 = vadd.f32 %v1390_v56, %v780_v22  ;;  %v1939_v45 = vpop.f32.mrb[2].mxu1 }
 0x172   : > { %v1485_v31 = vmul.f32 0.03125, %v2318_v3  ;;  %v794_v34 = vpop.f32.mrb[3].mxu1 }
 0x173   : > { %v1484_v54 = vmul.f32 0.03125, %v2319_v40  ;;  %v2107_v30 = vpop.f32.mrb[2].mxu0 }
 0x174   : > { %1502 = vst.msk [vmem:[%s3192_s9 + $0x8] sm:$0xff] %vm1500_vm0, %v1485_v31  ;;  %v2320_v27 = vadd.f32 %v2107_v30, %v1939_v45  ;;  %v1402_v37 = vpop.f32.mrb[3].mxu0 }
 0x175   : > { %1501 = vst.msk [vmem:[%s3192_s9] sm:$0xff] %vm1500_vm0, %v1484_v54  ;;  %v2321_v19 = vadd.f32 %v1402_v37, %v794_v34  ;;  %v1942_v61 = vpop.f32.mrb[4].mxu1 }
 0x176   : > { %v1487_v59 = vmul.f32 0.03125, %v2320_v27  ;;  %v808_v46 = vpop.f32.mrb[5].mxu1 }
 0x177   : > { %v1486_v41 = vmul.f32 0.03125, %v2321_v19  ;;  %v2110_v39 = vpop.f32.mrb[4].mxu0 }
 0x178   : > { %1504 = vst.msk [vmem:[%s3192_s9 + $0x18] sm:$0xff] %vm1500_vm0, %v1487_v59  ;;  %v2322_v55 = vadd.f32 %v2110_v39, %v1942_v61  ;;  %v1414_v16 = vpop.f32.mrb[5].mxu0 }
 0x179   : > { %1503 = vst.msk [vmem:[%s3192_s9 + $0x10] sm:$0xff] %vm1500_vm0, %v1486_v41  ;;  %v2323_v20 = vadd.f32 %v1414_v16, %v808_v46  ;;  %v1945_v2 = vpop.f32.mrb[6].mxu1 }
 0x17a   : > { %v1489_v28 = vmul.f32 0.03125, %v2322_v55  ;;  %v822_v53 = vpop.f32.mrb[7].mxu1 }
 0x17b   : > { %v1488_v0 = vmul.f32 0.03125, %v2323_v20  ;;  %v2113_v7 = vpop.f32.mrb[6].mxu0 }
 0x17c   : > { %1506 = vst.msk [vmem:[%s3192_s9 + $0x28] sm:$0xff] %vm1500_vm0, %v1489_v28  ;;  %v2324_v23 = vadd.f32 %v2113_v7, %v1945_v2  ;;  %v1426_v4 = vpop.f32.mrb[7].mxu0 }
 0x17d   : > { %1505 = vst.msk [vmem:[%s3192_s9 + $0x20] sm:$0xff] %vm1500_vm0, %v1488_v0  ;;  %v2325_v9 = vadd.f32 %v1426_v4, %v822_v53  ;;  %v1948_v12 = vpop.f32.mrb[8].mxu1 }
 0x17e   : > { %v1491_v51 = vmul.f32 0.03125, %v2324_v23  ;;  %v836_v15 = vpop.f32.mrb[9].mxu1 }
 0x17f   : > { %v1490_v32 = vmul.f32 0.03125, %v2325_v9  ;;  %v2116_v24 = vpop.f32.mrb[8].mxu0 }
 0x180   : > { %1508 = vst.msk [vmem:[%s3192_s9 + $0x38] sm:$0xff] %vm1500_vm0, %v1491_v51  ;;  %v2326_v33 = vadd.f32 %v2116_v24, %v1948_v12  ;;  %v1438_v25 = vpop.f32.mrb[9].mxu0 }
 0x181   : > { %1507 = vst.msk [vmem:[%s3192_s9 + $0x30] sm:$0xff] %vm1500_vm0, %v1490_v32  ;;  %v2327_v35 = vadd.f32 %v1438_v25, %v836_v15  ;;  %v1951_v13 = vpop.f32.mrb[10].mxu1 }
 0x182   : > { %v1493_v10 = vmul.f32 0.03125, %v2326_v33  ;;  %v850_v57 = vpop.f32.mrb[11].mxu1 }
 0x183   : > { %v1492_v36 = vmul.f32 0.03125, %v2327_v35  ;;  %v2119_v48 = vpop.f32.mrb[10].mxu0 }
 0x184   : > { %1510 = vst.msk [vmem:[%s3192_s9 + $0x48] sm:$0xff] %vm1500_vm0, %v1493_v10  ;;  %v2328_v49 = vadd.f32 %v2119_v48, %v1951_v13  ;;  %v1450_v18 = vpop.f32.mrb[11].mxu0 }
 0x185   : > { %1509 = vst.msk [vmem:[%s3192_s9 + $0x40] sm:$0xff] %vm1500_vm0, %v1492_v36  ;;  %v2329_v5 = vadd.f32 %v1450_v18, %v850_v57  ;;  %v1954_v14 = vpop.f32.mrb[12].mxu1 }
 0x186   : > { %v1495_v6 = vmul.f32 0.03125, %v2328_v49  ;;  %v864_v50 = vpop.f32.mrb[13].mxu1 }
 0x187   : > { %v1494_v11 = vmul.f32 0.03125, %v2329_v5  ;;  %v2122_v52 = vpop.f32.mrb[12].mxu0 }
 0x188   : > { %1512 = vst.msk [vmem:[%s3192_s9 + $0x58] sm:$0xff] %vm1500_vm0, %v1495_v6  ;;  %v2330_v8 = vadd.f32 %v2122_v52, %v1954_v14  ;;  %v1462_v21 = vpop.f32.mrb[13].mxu0 }
 0x189   : > { %1511 = vst.msk [vmem:[%s3192_s9 + $0x50] sm:$0xff] %vm1500_vm0, %v1494_v11  ;;  %v2331_v58 = vadd.f32 %v1462_v21, %v864_v50  ;;  %v1957_v62 = vpop.f32.mrb[14].mxu1 }
 0x18a   : > { %v1497_v29 = vmul.f32 0.03125, %v2330_v8  ;;  %v878_v17 = vpop.f32.mrb[15].mxu1 }
 0x18b   : > { %v1496_v44 = vmul.f32 0.03125, %v2331_v58  ;;  %v2125_v43 = vpop.f32.mrb[14].mxu0 }
 0x18c   : > { %1514 = vst.msk [vmem:[%s3192_s9 + $0x68] sm:$0xff] %vm1500_vm0, %v1497_v29  ;;  %v2332_v38 = vadd.f32 %v2125_v43, %v1957_v62  ;;  %v1474_v26 = vpop.f32.mrb[15].mxu0 }
 0x18d   : > { %1513 = vst.msk [vmem:[%s3192_s9 + $0x60] sm:$0xff] %vm1500_vm0, %v1496_v44  ;;  %v2333_v42 = vadd.f32 %v1474_v26, %v878_v17 }
 0x18e   : > { %v1499_v47 = vmul.f32 0.03125, %v2332_v38 }
 0x18f   : > { %v1498_v63 = vmul.f32 0.03125, %v2333_v42 }
 0x190   : > { %1516 = vst.msk [vmem:[%s3192_s9 + $0x78] sm:$0xff] %vm1500_vm0, %v1499_v47 }
 0x191   : > { %1515 = vst.msk [vmem:[%s3192_s9 + $0x70] sm:$0xff] %vm1500_vm0, %v1498_v63 }
 0x192 PF: > { %p12_p8 = scmp.ge.s32.totalorder %s2543_s14, 4   ;;  %s3364_s9 = smov %s2495_s10 }
 0x193   : > { %s3365_s10 = smov %s2499_s11  ;;  %s3366_s11 = smov %s2553_s17 }
 0x194   : > { %s3367_s12 = smov %s2543_s14  ;;  %14 = sbr.rel (!%p12_p8) target bundleno = 3 (0x3), region = 68 }
 0x19b   :  { %1539 = vsyncpa [#allocation3], 1 }
 0x19c   :  { %1541 = vsyncpa [#allocation3 + $0x1], 1 }

</bundles_post_ra>
